<compile_context>
chip_gen: v5e
topology: v5e:2x2
jax: 0.10.0
libtpu: 0.0.40
codegen_flags: <defaults>
</compile_context>

<pallas_src>
import functools

import jax
import jax.numpy as jnp
from jax import lax
from jax.experimental import pallas as pl
from jax.experimental.pallas import tpu as pltpu


# ---------------------------------------------------------------------------
# Helpers.
# ---------------------------------------------------------------------------
def _round_up(x, m):
    return (x + m - 1) // m * m


def _token_block(n, requested):
    """Per-grid-step token block TB: full-array when it fits in one block,
    otherwise a multiple of 8 (sublane-dense output blocks)."""
    tb = min(requested, n)
    if tb < n:
        tb = max(8, (tb // 8) * 8)
    return tb


def _keep_mask(seed_scalar, row_offset, shape, d, p):
    """Boolean keep-mask of `shape`=(rows, d) for global rows starting at
    `row_offset`.  Deterministic in (seed, global element index) only, so the
    mask is independent of how tokens are tiled across grid steps / paths."""
    rows = lax.broadcasted_iota(jnp.uint32, shape, 0)
    cols = lax.broadcasted_iota(jnp.uint32, shape, 1)
    row_off_u = lax.convert_element_type(row_offset, jnp.uint32)
    gidx = (rows + row_off_u) * jnp.uint32(d) + cols

    seed_u = lax.convert_element_type(seed_scalar, jnp.uint32)
    x = gidx ^ (seed_u * jnp.uint32(0x9E3779B9) + jnp.uint32(0x7F4A7C15))
    # lowbias32-style mixer: xor/shift/mul only (all plain VPU integer ops).
    x = x ^ (x >> 16)
    x = x * jnp.uint32(0x7FEB352D)
    x = x ^ (x >> 15)
    x = x * jnp.uint32(0x846CA68B)
    x = x ^ (x >> 16)

    thr = jnp.uint32(min(int(p * (2 ** 31)), 2 ** 31 - 1))
    return (x >> 1) >= thr       # keep-prob = 1 - p over 31 random bits


# ---------------------------------------------------------------------------
# Path A: small vocab -> table resident in VMEM, gather via one-hot matmul.
# ---------------------------------------------------------------------------
def _embed_onehot_kernel(seed_ref, ids_ref, w_ref, out_ref, *, p, tb, d, v):
    ids_blk = ids_ref[...]                        # (1, TB) int32
    table = w_ref[...]                            # (V, D), constant-index block

    vocab_iota = lax.broadcasted_iota(jnp.int32, (v, tb), 0)
    onehot_t = (vocab_iota == ids_blk).astype(table.dtype)        # (V, TB)
    # rows[t, d] = sum_v onehot_t[v, t] * table[v, d]   (MXU, f32 accumulate)
    rows = lax.dot_general(onehot_t, table,
                           (((0,), (0,)), ((), ())),
                           preferred_element_type=jnp.float32)    # (TB, D)

    if p > 0.0:
        keep = _keep_mask(seed_ref[0], pl.program_id(0) * tb, (tb, d), d, p)
        rows = jnp.where(keep, rows * jnp.float32(1.0 / (1.0 - p)),
                         jnp.float32(0.0))

    out_ref[...] = rows.astype(out_ref.dtype)


def _embed_resident(flat_ids, seed_arr, weight, n, v, d, p, block_tokens):
    tb = _token_block(n, block_tokens)
    nb = pl.cdiv(n, tb)
    n_pad = nb * tb
    # Only the tiny int32 id vector is padded (valid id 0); the output is
    # exactly (N, D) and the ragged last block is clipped on writeback, so
    # there is no full-output XLA copy anymore.
    ids_pad = flat_ids if n_pad == n else jnp.pad(flat_ids, (0, n_pad - n))
    ids_2d = ids_pad.reshape(nb, tb)

    kernel = functools.partial(_embed_onehot_kernel, p=float(p), tb=tb, d=d, v=v)
    return pl.pallas_call(
        kernel,
        out_shape=jax.ShapeDtypeStruct((n, d), weight.dtype),
        grid_spec=pltpu.PrefetchScalarGridSpec(
            num_scalar_prefetch=1,                       # seed -> SMEM
            grid=(nb,),
            in_specs=[
                # ids block: ~1 KiB DMA per step (minor; see review note).
                pl.BlockSpec((1, tb), lambda i, seed_r: (i, 0)),
                # Table block with constant index: DMA'd once per core, stays
                # resident.  Double-buffered by the pipeline, hence the 4 MiB
                # table budget cap in the wrapper (fits v5e 16 MiB / v7x 32 MiB
                # scoped VMEM defaults with room for outputs + one-hot temp).
                pl.BlockSpec((v, d), lambda i, seed_r: (0, 0)),
            ],
            out_specs=pl.BlockSpec((tb, d), lambda i, seed_r: (i, 0)),
        ),
        compiler_params=pltpu.CompilerParams(
            dimension_semantics=("parallel",)),
    )(seed_arr, ids_2d, weight)


# ---------------------------------------------------------------------------
# Path B: large vocab -> per-token-block manual-DMA row gather from HBM.
# ---------------------------------------------------------------------------
def _embed_gather_kernel(ids_ref, seed_ref, w_hbm, out_ref, rows_vmem, sem,
                         *, p, tb, d, n, inflight):
    i = pl.program_id(0)
    base = i * tb

    def issue(j):
        # Clamp so the (possibly) ragged last block re-reads a valid row
        # instead of issuing an out-of-bounds id lookup; ids themselves were
        # clamped to [0, V-1] in the wrapper, so the HBM DMA is always legal.
        tok = jnp.minimum(base + j, n - 1)
        pltpu.make_async_copy(w_hbm.at[ids_ref[tok]],
                              rows_vmem.at[j],
                              sem.at[j % inflight]).start()

    # Prime the window: `inflight` row DMAs outstanding.
    for j in range(inflight):
        issue(j)

    def body(j, carry):
        # Wait for row j, then reuse its semaphore slot for row j + inflight.
        pltpu.make_async_copy(w_hbm.at[0], rows_vmem.at[j],
                              sem.at[j % inflight]).wait()

        @pl.when(j + inflight < tb)
        def _():
            issue(j + inflight)

        return carry

    lax.fori_loop(0, tb, body, 0)

    # Dropout mask once per (TB, D) block (full lane/sublane utilization),
    # then one dense slab store.
    rows = rows_vmem[...]
    if p > 0.0:
        keep = _keep_mask(seed_ref[0], base, (tb, d), d, p)
        rows = jnp.where(keep,
                         rows.astype(jnp.float32) * jnp.float32(1.0 / (1.0 - p)),
                         jnp.float32(0.0))
    out_ref[...] = rows.astype(out_ref.dtype)


def _embed_gather(flat_ids, seed_arr, weight, n, v, d, p, block_tokens, inflight):
    # TODO(synk): for very large B*S the scalar-prefetched id vector lives in
    # SMEM (pads to next_pow2(4N) bytes); chunk the call at the wrapper level
    # if N reaches hundreds of thousands of tokens.
    tb = _token_block(n, block_tokens)
    nb = pl.cdiv(n, tb)
    inflight = max(1, min(inflight, tb))

    kernel = functools.partial(_embed_gather_kernel, p=float(p), tb=tb, d=d,
                               n=n, inflight=inflight)
    return pl.pallas_call(
        kernel,
        out_shape=jax.ShapeDtypeStruct((n, d), weight.dtype),
        grid_spec=pltpu.PrefetchScalarGridSpec(
            num_scalar_prefetch=2,                       # ids, seed -> SMEM
            grid=(nb,),
            in_specs=[pl.BlockSpec(memory_space=pl.ANY)],    # table stays in HBM
            out_specs=pl.BlockSpec((tb, d), lambda i, ids_r, seed_r: (i, 0)),
            scratch_shapes=[pltpu.VMEM((tb, d), weight.dtype),
                            pltpu.SemaphoreType.DMA((inflight,))],
        ),
        compiler_params=pltpu.CompilerParams(
            dimension_semantics=("parallel",)),
    )(flat_ids, seed_arr, weight)


# ---------------------------------------------------------------------------
# Public wrapper (== EmbedLayer.forward).
# ---------------------------------------------------------------------------
def embed_layer_forward(ids, weight, *, dropout_p: float = 0.0, seed: int = 0,
                        block_tokens: int = 256,
                        gather_copies_in_flight: int = 8,
                        table_vmem_budget_bytes: int = 4 * 1024 * 1024,
                        max_onehot_vocab=None):
    """Pallas equivalent of EmbedLayer.forward.

    ids:    (B, S) integer token ids.
    weight: (V, D) embedding table (padding_idx row already zeroed).
    dropout_p: train-mode inverted dropout rate (0.0 == identity / eval mode).
               Vary `seed` per training step; the mask is deterministic in
               (seed, element index).
    """
    B, S = ids.shape
    V, D = weight.shape
    N = B * S
    assert 0.0 <= dropout_p < 1.0

    # Clamp ids so a bad id can never produce an out-of-bounds HBM access.
    flat_ids = jnp.clip(ids.reshape(N).astype(jnp.int32), 0, V - 1)
    seed_arr = jnp.asarray([seed], dtype=jnp.int32)

    if max_onehot_vocab is None:
        # TODO(synk): per-generation tuning (MXU TF/s vs row-DMA latency); the
        # crossover can rise to 2048-4096 on v6e/v7x bf16 and should drop to
        # ~256-512 on v5e f32.  A dtype-aware default is a portable compromise.
        max_onehot_vocab = 2048 if weight.dtype.itemsize <= 2 else 512

    table_bytes = V * D * weight.dtype.itemsize
    use_resident = (table_bytes <= table_vmem_budget_bytes
                    and V <= max_onehot_vocab)

    if use_resident:
        out_flat = _embed_resident(flat_ids, seed_arr, weight, N, V, D,
                                   dropout_p, block_tokens)
    else:
        out_flat = _embed_gather(flat_ids, seed_arr, weight, N, V, D,
                                 dropout_p, block_tokens,
                                 gather_copies_in_flight)
    return out_flat.reshape(B, S, D)


def make_embedding_weight(key, num_embeddings, embedding_dim, ignore=None,
                          dtype=jnp.float32):
    """Init mimicking nn.Embedding (N(0,1)); padding_idx row zeroed."""
    w = jax.random.normal(key, (num_embeddings, embedding_dim), dtype=dtype)
    if ignore is not None:
        w = w.at[ignore, :].set(0.0)
    return w


if __name__ == "__main__":
    # Small shapes consistent with the module: batch=2, seq=8, vocab=32,
    # embedding_dim=128, padding_idx=0.
    B, S, V, D = 2, 8, 32, 128
    IGNORE = 0
    DROPOUT_P = 0.1

    key = jax.random.PRNGKey(0)
    k_w, k_ids = jax.random.split(key)
    weight = make_embedding_weight(k_w, V, D, ignore=IGNORE)
    ids = jax.random.randint(k_ids, (B, S), minval=0, maxval=V, dtype=jnp.int32)

    ref = jnp.take(weight, ids, axis=0)

    # --- p == 0, table-resident fast path: matches jnp.take.
    out0 = jax.block_until_ready(embed_layer_forward(ids, weight, dropout_p=0.0))
    assert out0.shape == (B, S, D)
    assert jnp.allclose(out0, ref, atol=1e-5), "resident-path gather mismatch"

    # padding_idx rows embed to zeros.
    pad_ids = jnp.full((1, 4), IGNORE, dtype=jnp.int32)
    out_pad = jax.block_until_ready(embed_layer_forward(pad_ids, weight))
    assert jnp.allclose(out_pad, 0.0), "padding_idx row not zero"

    # --- p == 0, large-vocab manual-DMA gather path (forced): exact match.
    out1 = jax.block_until_ready(embed_layer_forward(
        ids, weight, dropout_p=0.0, table_vmem_budget_bytes=0))
    assert jnp.allclose(out1, ref, atol=1e-5), "gather path mismatch"

    # --- dropout > 0 (train-mode nn.Dropout semantics), resident path.
    outd = jax.block_until_ready(
        embed_layer_forward(ids, weight, dropout_p=DROPOUT_P, seed=123))
    assert outd.shape == (B, S, D)
    assert bool(jnp.all(jnp.isfinite(outd)))
    kept = outd != 0.0
    scaled_ref = ref / (1.0 - DROPOUT_P)
    assert jnp.allclose(jnp.where(kept, outd, 0.0),
                        jnp.where(kept, scaled_ref, 0.0), atol=1e-4)
    keep_frac = float(jnp.mean(kept.astype(jnp.float32)))
    assert 0.75 <= keep_frac <= 0.99, f"suspicious keep fraction {keep_frac}"

    # --- dropout > 0, gather path (forced): mask is tiling/path independent,
    # so it must agree with the resident-path result.
    outd_b = jax.block_until_ready(embed_layer_forward(
        ids, weight, dropout_p=DROPOUT_P, seed=123, table_vmem_budget_bytes=0))
    assert bool(jnp.all(jnp.isfinite(outd_b)))
    assert jnp.allclose(outd_b, outd, atol=1e-4), "dropout mask differs across paths"

    print("KERNEL_OK")
</pallas_src>

<mosaic_0001>
module attributes {stable_mosaic.version = 11 : i64} {
  func.func @_embed_onehot_kernel(%arg0: i32, %arg1: memref<1xi32, #tpu.memory_space<smem>>, %arg2: memref<1x16xi32, #tpu.memory_space<vmem>>, %arg3: memref<32x128xf32, #tpu.memory_space<vmem>>, %arg4: memref<16x128xf32, #tpu.memory_space<vmem>>) attributes {dimension_semantics = [#tpu.dimension_semantics<parallel>], iteration_bounds = array<i64: 1>, scalar_prefetch = 1 : i64, scratch_operands = 0 : i64, tpu.core_type = #tpu.core_type<tc>, window_params = [{transform_indices = @transform_0, window_bounds = array<i64: 1, 16>}, {pipeline_mode = #tpu.pipeline_mode<synchronous>, transform_indices = @transform_1, window_bounds = array<i64: 32, 128>}, {transform_indices = @transform_2, window_bounds = array<i64: 16, 128>}]} {
    %c0 = arith.constant 0 : index
    %c0_0 = arith.constant 0 : index
    %0 = vector.load %arg2[%c0, %c0_0] : memref<1x16xi32, #tpu.memory_space<vmem>>, vector<1x16xi32>
    %c0_1 = arith.constant 0 : index
    %c0_2 = arith.constant 0 : index
    %1 = vector.load %arg3[%c0_1, %c0_2] : memref<32x128xf32, #tpu.memory_space<vmem>>, vector<32x128xf32>
    %2 = tpu.iota {dimensions = array<i32: 0>} : vector<32x16xi32>
    %3 = vector.broadcast %0 : vector<1x16xi32> to vector<32x16xi32>
    %4 = arith.cmpi eq, %2, %3 : vector<32x16xi32>
    %5 = arith.extui %4 : vector<32x16xi1> to vector<32x16xi32>
    %6 = arith.sitofp %5 : vector<32x16xi32> to vector<32x16xf32>
    %cst = arith.constant dense<0.000000e+00> : vector<16x128xf32>
    %7 = tpu.matmul %6, %1, %cst {dimension_numbers = #tpu.dot_dimension_numbers<[0], [0], [1], [1], [0, 1, 1, 1], [], []>} : vector<32x16xf32>, vector<32x128xf32>, vector<16x128xf32> -> vector<16x128xf32>
    %c0_3 = arith.constant 0 : index
    %c0_4 = arith.constant 0 : index
    %8 = vector.load %arg4[%c0_3, %c0_4] : memref<16x128xf32, #tpu.memory_space<vmem>>, vector<16x128xf32>
    tpu.vector_store %arg4[%c0_3, %c0_4], %7 {strides = array<i32>} : memref<16x128xf32, #tpu.memory_space<vmem>>, vector<16x128xf32>,
    return
  }
  func.func @transform_0(%arg0: i32, %arg1: memref<1xi32, #tpu.memory_space<smem>>) -> (i32, i32) {
    %c0_i32 = arith.constant 0 : i32
    %c0_i32_0 = arith.constant 0 : i32
    return %arg0, %c0_i32 : i32, i32
  }
  func.func @transform_1(%arg0: i32, %arg1: memref<1xi32, #tpu.memory_space<smem>>) -> (i32, i32) {
    %c0_i32 = arith.constant 0 : i32
    %c0_i32_0 = arith.constant 0 : i32
    %c0_i32_1 = arith.constant 0 : i32
    return %c0_i32, %c0_i32_0 : i32, i32
  }
  func.func @transform_2(%arg0: i32, %arg1: memref<1xi32, #tpu.memory_space<smem>>) -> (i32, i32) {
    %c0_i32 = arith.constant 0 : i32
    %c0_i32_0 = arith.constant 0 : i32
    return %arg0, %c0_i32 : i32, i32
  }
}

</mosaic_0001>

<bundles_post_ra>
// kernel: tpu_custom_call.1
= control target key start
LH: loop header
LB: loop body
LE: loop exit
PB: predicated region body
PF: predicated region fallthrough
CT: control target
= control target key end

     0   :  { %9 = vsyncpa [#allocation5], 0  ;;  %s244_s0 = inlined_call_operand.<no memory space> [shape: s32[1], index: 0, kind: input, shape index: {}]   ;;  %s245_s1 = inlined_call_operand.vmem [shape: s32[1,16], index: 1, kind: input, shape index: {}]   ;;  %s246_s2 = inlined_call_operand.hbm [shape: f32[32,128], index: 2, kind: input, shape index: {}]   ;;  %s247_s3 = inlined_call_operand.hbm [shape: f32[16,128], index: 3, kind: output, shape index: {}]  }
   0x1   :  { %10 = vsyncpa [#allocation6], 0  ;;  %s17_s14 = sshll.u32 %s246_s2, 4  ;;  %s204_s15 = smov [#allocation4]   ;;  %s18_s14 = int_to_ptr.hbm [resolvable:$true] %s17_s14 }
   0x2   :  { %s19_s16 = sshll.u32 %s204_s15, 4  ;;  %s205_s0 = smov 128   ;;  %s20_s16 = int_to_ptr.vmem [resolvable:$true] %s19_s16 }
   0x3   :  { %s206_s17 = smov 8  }
   0x4   :  { %25 = dma.hbm_to_vmem [thread:$0]  %s18_s14, 512, %s20_s16, [#allocation5], %s205_s0, %s205_s0, %s206_s17  }
   0x5   :  { %200 = dma.done.wait [#allocation5], 512  }
   0x6   :  { %201 = vsyncadd [#allocation5], 4294966784  ;;  %v35_v0 = vlaneseq  ;;  %v151_v2 = vld [vmem:[%s245_s1] ss:$0 sm:$0xff]  ;;  %v34_v3 = vld [vmem:[#allocation4 + $0x18] sm:$0xff]  ;;  %v207_v7 = vmov 0.0  }
   0x7   :  { %104 = vmatpush.msra.mxu0 %v34_v3  ;;  %v33_v4 = vld [vmem:[#allocation4 + $0x10] sm:$0xff]  ;;  %142 = vmatpush.msra.mxu1 %v34_v3  ;;  %v32_v6 = vld [vmem:[#allocation4 + $0x8] sm:$0xff]  ;;  %v31_v9 = vld [vmem:[#allocation4] sm:$0xff]  ;;  %vm85_vm4 = vcmask 261120   ;;  %s208_s1 = smov [#allocation7]   ;;  %s123_s22 = sshll.u32 %s247_s3, 4  ;;  %s124_s22 = int_to_ptr.hbm [resolvable:$true] %s123_s22 }
   0x8   :  { %v36_v1 = vshrl.u32 %v35_v0, 7  ;;  %s121_s2 = sshll.u32 %s208_s1, 4  ;;  %s122_s2 = int_to_ptr.vmem [resolvable:$true] %s121_s2 }
   0x9   :  { %105 = vmatpush.msra.mxu0 %v33_v4  ;;  %143 = vmatpush.msra.mxu1 %v33_v4 }
   0xa   :  { %vm41_vm0 = vcmp.eq.s32.totalorder %v36_v1, %v151_v2  ;;  %v37_v5 = vadd.s32 8, %v36_v1  ;;  %v38_v11 = vadd.s32 16, %v36_v1  ;;  %v39_v13 = vadd.s32 24, %v36_v1 }
   0xb   :  { %v136_v8 = vsel %vm41_vm0, 1.0, %v207_v7  ;;  %106 = vmatpush.msra.mxu0 %v32_v6  ;;  %144 = vmatpush.msra.mxu1 %v32_v6 }
   0xc   :  { %53 = vxpose.xlu0.b32.start [1/4] (short) (narrow) %v136_v8, 16  ;;  %vm42_vm1 = vcmp.eq.s32.totalorder %v37_v5, %v151_v2  ;;  %vm43_vm2 = vcmp.eq.s32.totalorder %v38_v11, %v151_v2  ;;  %vm44_vm3 = vcmp.eq.s32.totalorder %v39_v13, %v151_v2 }
   0xd   :  { %107 = vmatpush.msra.mxu0 %v31_v9  ;;  %145 = vmatpush.msra.mxu1 %v31_v9  ;;  %v137_v10 = vsel %vm42_vm1, 1.0, %v207_v7  ;;  %v138_v12 = vsel %vm43_vm2, 1.0, %v207_v7  ;;  %v139_v14 = vsel %vm44_vm3, 1.0, %v207_v7 }
  0x14   :  { %54 = vxpose.xlu0.b32.cont [2/4] (short) (narrow) %v137_v10, 16 }
  0x1c   :  { %55 = vxpose.xlu0.b32.cont [3/4] (short) (narrow) %v138_v12, 16 }
  0x24   :  { %56 = vxpose.xlu0.b32.end [4/4] (short) (narrow) %v139_v14, 16 }
  0xb0   :  { %v69_v15 = vpop.trf.xlu0 }
  0xb1   :  { %140 = vmatmul.msk.f32.vlgmr.msra.gmra.mxu0 %vm85_vm4, %v69_v15 }
  0xb8   :  { %v70_v16 = vpop.trf.xlu0 }
  0xb9   :  { %141 = vmatmul.msk.f32.vlgmr.msra.gmra.mxu1 %vm85_vm4, %v70_v16 }
 0x12e   :  { %v109_v17 = vpop.f32.mrf.mxu0 }
 0x12f   :  { %115 = vst [vmem:[#allocation7] sm:$0xff] %v109_v17 }
 0x136   :  { %v112_v18 = vpop.f32.mrf.mxu1 }
 0x137   :  { %116 = vst [vmem:[#allocation7 + $0x8] sm:$0xff] %v112_v18 }
 0x138   :  { %129 = dma.vmem_to_hbm [thread:$0]  %s122_s2, 256, %s124_s22, [#allocation6], %s205_s0, %s205_s0, %s206_s17  }
 0x139   :  { %202 = dma.done.wait [#allocation6], 256  }
 0x13a   :  { %203 = vsyncadd [#allocation6], 4294967040 }
 0x13b   :  { %134 = vsyncpa [#allocation5], 1 }
 0x13c   :  { %135 = vsyncpa [#allocation6], 1 }

</bundles_post_ra>
